<compile_context>
chip_gen: v7x
topology: tpu7x:2x2x1
jax: 0.10.0
libtpu: 0.0.40
codegen_flags: <defaults>
</compile_context>

<pallas_src>
import jax
import jax.numpy as jnp
from jax.experimental import pallas as pl
from jax.experimental.pallas import tpu as pltpu

_LANE = 128
_SUBLANE = 8
_TARGET_STEPS = 4  # >=2 grid steps per TC on v7x (2 TCs); pipelines DMA on v5e/v6e too


def _round_up(x, m):
    return ((x + m - 1) // m) * m


# --------------------------------------------------------------------------- kernel
def _mlp_kernel(x_ref, w1_ref, b1_ref, w2_ref, b2_ref, w3_ref, b3_ref, o_ref):
    # x arrives f32 straight from HBM; cast to the MXU compute dtype in-kernel
    # (plenty of VPU slack here; avoids a separate wrapper-side astype pass over x).
    x = x_ref[...].astype(w1_ref.dtype)
    # Layer 1: MXU matmul, f32 accumulate; bias + ReLU in f32 (Dropout = identity).
    h1 = jnp.dot(x, w1_ref[...], preferred_element_type=jnp.float32)
    h1 = jnp.maximum(h1 + b1_ref[...], 0.0)
    # Layer 2 (cast activations to the compute dtype only at the MXU input).
    h2 = jnp.dot(h1.astype(w2_ref.dtype), w2_ref[...], preferred_element_type=jnp.float32)
    h2 = jnp.maximum(h2 + b2_ref[...], 0.0)
    # Layer 3: narrow output head -> (tile_b, d_out) store (masked lanes, full value rows).
    out = jnp.dot(h2.astype(w3_ref.dtype), w3_ref[...], preferred_element_type=jnp.float32)
    o_ref[...] = (out + b3_ref[...]).astype(o_ref.dtype)


# --------------------------------------------------------------------------- params
def init_params(key, input_dim, hidden_dim=128, output_dim=4, dtype=jnp.float32):
    """Kaiming-uniform-like init, same shapes as the PyTorch module (w stored (in,out))."""
    h2 = hidden_dim // 2
    ks = jax.random.split(key, 6)

    def lin(kw, kb, fan_in, fan_out):
        bound = 1.0 / jnp.sqrt(fan_in)
        w = jax.random.uniform(kw, (fan_in, fan_out), dtype, -bound, bound)
        b = jax.random.uniform(kb, (1, fan_out), dtype, -bound, bound)
        return w, b

    w1, b1 = lin(ks[0], ks[1], input_dim, hidden_dim)
    w2, b2 = lin(ks[2], ks[3], hidden_dim, h2)
    w3, b3 = lin(ks[4], ks[5], h2, output_dim)
    return {"w1": w1, "b1": b1, "w2": w2, "b2": b2, "w3": w3, "b3": b3}


def pack_params(params, compute_dtype=jnp.bfloat16):
    """One-time preprocessing: zero-pad the *hidden* dims to the 128-lane width and cast
    the weight matrices to the MXU compute dtype (biases stay f32). The output head is
    kept narrow (d_out columns) so the kernel stores only useful bytes. Zero rows/cols
    plus ReLU(0)=0 keep the padded math exactly equivalent to the unpadded module.
    Use compute_dtype=jnp.float32 for exact parity with the f32 PyTorch module."""
    w1, b1 = params["w1"], params["b1"]
    w2, b2 = params["w2"], params["b2"]
    w3, b3 = params["w3"], params["b3"]
    d_in, h1 = w1.shape
    h2 = w2.shape[1]
    d_out = w3.shape[1]
    h1p, h2p = _round_up(h1, _LANE), _round_up(h2, _LANE)

    def pad2(a, rows, cols):
        return jnp.pad(a, ((0, rows - a.shape[0]), (0, cols - a.shape[1])))

    packed = {
        "w1": pad2(w1, d_in, h1p).astype(compute_dtype),
        "b1": pad2(b1, 1, h1p).astype(jnp.float32),
        "w2": pad2(w2, h1p, h2p).astype(compute_dtype),
        "b2": pad2(b2, 1, h2p).astype(jnp.float32),
        "w3": pad2(w3, h2p, d_out).astype(compute_dtype),  # output head stays narrow
        "b3": b3.astype(jnp.float32),
    }
    return packed, d_out


# --------------------------------------------------------------------------- wrapper
def behavior_decoder_forward(x, packed, d_out, *, tile_b=None):
    """x: (B, input_dim) float32. packed: output of pack_params (lane-padded hidden dims)."""
    B, d_in = x.shape
    w1, b1 = packed["w1"], packed["b1"]
    w2, b2 = packed["w2"], packed["b2"]
    w3, b3 = packed["w3"], packed["b3"]
    h1p, h2p = w1.shape[1], w2.shape[1]
    out_dtype = x.dtype

    # Step-count-driven batch tile: ~_TARGET_STEPS grid steps (>=2 per v7x TC), rounded
    # to 16 rows (sublane packing), capped so per-row VMEM footprint stays trivial.
    if tile_b is None:
        tile_b = _round_up(pl.cdiv(B, _TARGET_STEPS), 16)
        tile_b = max(16, min(tile_b, 1024))

    # Only pad the batch to a sublane multiple (usually a no-op). Partial last tiles
    # rely on Pallas boundary masking: OOB input rows are unspecified, OOB output rows
    # are discarded -- safe because there is no cross-row reduction in this kernel.
    B_pad = _round_up(B, _SUBLANE)
    tile_b = min(int(tile_b), B_pad)
    tile_b = max(_SUBLANE, (tile_b // _SUBLANE) * _SUBLANE)
    x_in = jnp.pad(x, ((0, B_pad - B), (0, 0))) if B_pad != B else x
    grid = (pl.cdiv(B_pad, tile_b),)

    flops = 2 * B_pad * (d_in * h1p + h1p * h2p + h2p * d_out)
    weight_bytes = sum(int(a.size) * a.dtype.itemsize for a in (w1, b1, w2, b2, w3, b3))
    bytes_accessed = (int(x_in.size) * x_in.dtype.itemsize
                      + B_pad * d_out * jnp.dtype(out_dtype).itemsize
                      + weight_bytes)
    cost = pl.CostEstimate(flops=int(flops), transcendentals=0,
                           bytes_accessed=int(bytes_accessed))

    full = lambda shape: pl.BlockSpec(shape, lambda i: (0, 0))

    out = pl.pallas_call(
        _mlp_kernel,
        out_shape=jax.ShapeDtypeStruct((B_pad, d_out), out_dtype),
        grid_spec=pltpu.PrefetchScalarGridSpec(
            num_scalar_prefetch=0,
            grid=grid,
            in_specs=[
                pl.BlockSpec((tile_b, d_in), lambda i: (i, 0)),  # x tile over batch
                full((d_in, h1p)),    # w1 (resident)
                full((1, h1p)),       # b1
                full((h1p, h2p)),     # w2
                full((1, h2p)),       # b2
                full((h2p, d_out)),   # w3 (narrow output head)
                full((1, d_out)),     # b3
            ],
            out_specs=pl.BlockSpec((tile_b, d_out), lambda i: (i, 0)),
        ),
        compiler_params=pltpu.CompilerParams(
            dimension_semantics=("parallel",),
        ),
        cost_estimate=cost,
    )(x_in, w1, b1, w2, b2, w3, b3)

    return out if B_pad == B else out[:B]


# --------------------------------------------------------------------------- reference
def reference_forward(x, p):
    h1 = jnp.maximum(x @ p["w1"] + p["b1"], 0.0)
    h2 = jnp.maximum(h1 @ p["w2"] + p["b2"], 0.0)
    return h2 @ p["w3"] + p["b3"]


if __name__ == "__main__":
    key = jax.random.PRNGKey(0)
    k_x, k_p, k_x2 = jax.random.split(key, 3)

    B, input_dim, hidden_dim, output_dim = 256, 32, 64, 4
    x = jax.random.normal(k_x, (B, input_dim), dtype=jnp.float32)
    params = init_params(k_p, input_dim, hidden_dim=hidden_dim, output_dim=output_dim)
    packed, d_out = pack_params(params)

    out = jax.block_until_ready(behavior_decoder_forward(x, packed, d_out))
    ref = reference_forward(x, params)
    assert out.shape == (B, output_dim), out.shape
    assert jnp.allclose(out, ref, atol=2e-2, rtol=2e-2), "mismatch vs reference (B=256)"

    # Ragged batch (not a multiple of the tile): exercises the partial-last-block path.
    B2 = 200
    x2 = jax.random.normal(k_x2, (B2, input_dim), dtype=jnp.float32)
    out2 = jax.block_until_ready(behavior_decoder_forward(x2, packed, d_out))
    ref2 = reference_forward(x2, params)
    assert out2.shape == (B2, output_dim), out2.shape
    assert jnp.allclose(out2, ref2, atol=2e-2, rtol=2e-2), "mismatch vs reference (B=200)"

    print("KERNEL_OK")
</pallas_src>

<mosaic_0001>
module attributes {stable_mosaic.version = 11 : i64} {
  func.func @_mlp_kernel(%arg0: i32, %arg1: memref<64x32xf32, #tpu.memory_space<vmem>>, %arg2: memref<32x128xbf16, #tpu.memory_space<vmem>>, %arg3: memref<1x128xf32, #tpu.memory_space<vmem>>, %arg4: memref<128x128xbf16, #tpu.memory_space<vmem>>, %arg5: memref<1x128xf32, #tpu.memory_space<vmem>>, %arg6: memref<128x4xbf16, #tpu.memory_space<vmem>>, %arg7: memref<1x4xf32, #tpu.memory_space<vmem>>, %arg8: memref<64x4xf32, #tpu.memory_space<vmem>>) attributes {dimension_semantics = [#tpu.dimension_semantics<parallel>], iteration_bounds = array<i64: 4>, scalar_prefetch = 0 : i64, scratch_operands = 0 : i64, tpu.core_type = #tpu.core_type<tc>, window_params = [{transform_indices = @transform_0, window_bounds = array<i64: 64, 32>}, {pipeline_mode = #tpu.pipeline_mode<synchronous>, transform_indices = @transform_1, window_bounds = array<i64: 32, 128>}, {pipeline_mode = #tpu.pipeline_mode<synchronous>, transform_indices = @transform_2, window_bounds = array<i64: 1, 128>}, {pipeline_mode = #tpu.pipeline_mode<synchronous>, transform_indices = @transform_3, window_bounds = array<i64: 128, 128>}, {pipeline_mode = #tpu.pipeline_mode<synchronous>, transform_indices = @transform_4, window_bounds = array<i64: 1, 128>}, {pipeline_mode = #tpu.pipeline_mode<synchronous>, transform_indices = @transform_5, window_bounds = array<i64: 128, 4>}, {pipeline_mode = #tpu.pipeline_mode<synchronous>, transform_indices = @transform_6, window_bounds = array<i64: 1, 4>}, {transform_indices = @transform_7, window_bounds = array<i64: 64, 4>}]} {
    %c0 = arith.constant 0 : index
    %c0_0 = arith.constant 0 : index
    %0 = vector.load %arg1[%c0, %c0_0] : memref<64x32xf32, #tpu.memory_space<vmem>>, vector<64x32xf32>
    %1 = arith.truncf %0 : vector<64x32xf32> to vector<64x32xbf16>
    %c0_1 = arith.constant 0 : index
    %c0_2 = arith.constant 0 : index
    %2 = vector.load %arg2[%c0_1, %c0_2] : memref<32x128xbf16, #tpu.memory_space<vmem>>, vector<32x128xbf16>
    %cst = arith.constant dense<0.000000e+00> : vector<64x128xf32>
    %3 = tpu.matmul %1, %2, %cst {dimension_numbers = #tpu.dot_dimension_numbers<[1], [0], [0], [1], [0, 0, 1, 1], [], []>} : vector<64x32xbf16>, vector<32x128xbf16>, vector<64x128xf32> -> vector<64x128xf32>
    %c0_3 = arith.constant 0 : index
    %c0_4 = arith.constant 0 : index
    %4 = vector.load %arg3[%c0_3, %c0_4] : memref<1x128xf32, #tpu.memory_space<vmem>>, vector<1x128xf32>
    %5 = vector.broadcast %4 : vector<1x128xf32> to vector<64x128xf32>
    %6 = arith.addf %3, %5 : vector<64x128xf32>
    %cst_5 = arith.constant 0.000000e+00 : f32
    %7 = vector.broadcast %cst_5 : f32 to vector<64x128xf32>
    %8 = arith.maximumf %6, %7 : vector<64x128xf32>
    %9 = arith.truncf %8 : vector<64x128xf32> to vector<64x128xbf16>
    %c0_6 = arith.constant 0 : index
    %c0_7 = arith.constant 0 : index
    %10 = vector.load %arg4[%c0_6, %c0_7] : memref<128x128xbf16, #tpu.memory_space<vmem>>, vector<128x128xbf16>
    %cst_8 = arith.constant dense<0.000000e+00> : vector<64x128xf32>
    %11 = tpu.matmul %9, %10, %cst_8 {dimension_numbers = #tpu.dot_dimension_numbers<[1], [0], [0], [1], [0, 0, 1, 1], [], []>} : vector<64x128xbf16>, vector<128x128xbf16>, vector<64x128xf32> -> vector<64x128xf32>
    %c0_9 = arith.constant 0 : index
    %c0_10 = arith.constant 0 : index
    %12 = vector.load %arg5[%c0_9, %c0_10] : memref<1x128xf32, #tpu.memory_space<vmem>>, vector<1x128xf32>
    %13 = vector.broadcast %12 : vector<1x128xf32> to vector<64x128xf32>
    %14 = arith.addf %11, %13 : vector<64x128xf32>
    %cst_11 = arith.constant 0.000000e+00 : f32
    %15 = vector.broadcast %cst_11 : f32 to vector<64x128xf32>
    %16 = arith.maximumf %14, %15 : vector<64x128xf32>
    %17 = arith.truncf %16 : vector<64x128xf32> to vector<64x128xbf16>
    %c0_12 = arith.constant 0 : index
    %c0_13 = arith.constant 0 : index
    %18 = vector.load %arg6[%c0_12, %c0_13] : memref<128x4xbf16, #tpu.memory_space<vmem>>, vector<128x4xbf16>
    %cst_14 = arith.constant dense<0.000000e+00> : vector<64x4xf32>
    %19 = tpu.matmul %17, %18, %cst_14 {dimension_numbers = #tpu.dot_dimension_numbers<[1], [0], [0], [1], [0, 0, 1, 1], [], []>} : vector<64x128xbf16>, vector<128x4xbf16>, vector<64x4xf32> -> vector<64x4xf32>
    %c0_15 = arith.constant 0 : index
    %c0_16 = arith.constant 0 : index
    %20 = vector.load %arg7[%c0_15, %c0_16] : memref<1x4xf32, #tpu.memory_space<vmem>>, vector<1x4xf32>
    %21 = vector.broadcast %20 : vector<1x4xf32> to vector<64x4xf32>
    %22 = arith.addf %19, %21 : vector<64x4xf32>
    %c0_17 = arith.constant 0 : index
    %c0_18 = arith.constant 0 : index
    %23 = vector.load %arg8[%c0_17, %c0_18] : memref<64x4xf32, #tpu.memory_space<vmem>>, vector<64x4xf32>
    tpu.vector_store %arg8[%c0_17, %c0_18], %22 {strides = array<i32>} : memref<64x4xf32, #tpu.memory_space<vmem>>, vector<64x4xf32>,
    return
  }
  func.func @transform_0(%arg0: i32) -> (i32, i32) {
    %c0_i32 = arith.constant 0 : i32
    %c0_i32_0 = arith.constant 0 : i32
    return %arg0, %c0_i32 : i32, i32
  }
  func.func @transform_1(%arg0: i32) -> (i32, i32) {
    %c0_i32 = arith.constant 0 : i32
    %c0_i32_0 = arith.constant 0 : i32
    %c0_i32_1 = arith.constant 0 : i32
    return %c0_i32, %c0_i32_0 : i32, i32
  }
  func.func @transform_2(%arg0: i32) -> (i32, i32) {
    %c0_i32 = arith.constant 0 : i32
    %c0_i32_0 = arith.constant 0 : i32
    %c0_i32_1 = arith.constant 0 : i32
    return %c0_i32, %c0_i32_0 : i32, i32
  }
  func.func @transform_3(%arg0: i32) -> (i32, i32) {
    %c0_i32 = arith.constant 0 : i32
    %c0_i32_0 = arith.constant 0 : i32
    %c0_i32_1 = arith.constant 0 : i32
    return %c0_i32, %c0_i32_0 : i32, i32
  }
  func.func @transform_4(%arg0: i32) -> (i32, i32) {
    %c0_i32 = arith.constant 0 : i32
    %c0_i32_0 = arith.constant 0 : i32
    %c0_i32_1 = arith.constant 0 : i32
    return %c0_i32, %c0_i32_0 : i32, i32
  }
  func.func @transform_5(%arg0: i32) -> (i32, i32) {
    %c0_i32 = arith.constant 0 : i32
    %c0_i32_0 = arith.constant 0 : i32
    %c0_i32_1 = arith.constant 0 : i32
    return %c0_i32, %c0_i32_0 : i32, i32
  }
  func.func @transform_6(%arg0: i32) -> (i32, i32) {
    %c0_i32 = arith.constant 0 : i32
    %c0_i32_0 = arith.constant 0 : i32
    %c0_i32_1 = arith.constant 0 : i32
    return %c0_i32, %c0_i32_0 : i32, i32
  }
  func.func @transform_7(%arg0: i32) -> (i32, i32) {
    %c0_i32 = arith.constant 0 : i32
    %c0_i32_0 = arith.constant 0 : i32
    return %arg0, %c0_i32 : i32, i32
  }
}

</mosaic_0001>

<bundles_post_ra>
// kernel: tpu_custom_call.1
= control target key start
LH: loop header
LB: loop body
LE: loop exit
PB: predicated region body
PF: predicated region fallthrough
CT: control target
= control target key end

     0   :  { %s957_s24 = smov 0   ;;  %s1056_s0 = inlined_call_operand.vmem [shape: f32[256,32], index: 0, kind: input, shape index: {}]   ;;  %s1057_s1 = inlined_call_operand.vmem [shape: bf16[32,128], index: 1, kind: input, shape index: {}]   ;;  %s1058_s2 = inlined_call_operand.vmem [shape: f32[1,128], index: 2, kind: input, shape index: {}]   ;;  %s1059_s3 = inlined_call_operand.vmem [shape: bf16[128,128], index: 3, kind: input, shape index: {}]   ;;  %s1060_s4 = inlined_call_operand.vmem [shape: f32[1,128], index: 4, kind: input, shape index: {}]   ;;  %s1061_s5 = inlined_call_operand.vmem [shape: bf16[128,4], index: 5, kind: input, shape index: {}]   ;;  %s1062_s6 = inlined_call_operand.vmem [shape: f32[1,4], index: 6, kind: input, shape index: {}]   ;;  %s1063_s7 = inlined_call_operand.vmem [shape: f32[256,4], index: 7, kind: output, shape index: {}]  }
   0x1 LB: > { %s757_s25 = sadd.s32 4294967295, %s915_s24   ;;  %p761_p0 = scmp.ge.s32.totalorder %s915_s24, 1  ;;  %s915_s24 = sphi %s957_s24, %s17_s24  }
   0x2   : > { %p238_p1 = scmp.lt.s32.totalorder %s915_s24, 5 }
   0x4   : > { %p239_p2 = pnand %p761_p0, %p238_p1 }
   0x5   : > { %v891_v0 = vld [vmem:[%s1057_s1] sm:$0xff] (!%p239_p2)   ;;  %s762_s28 = sshll.u32 (!%p239_p2), %s757_s25, 3  ;;  %v892_v1 = vld [vmem:[%s1057_s1 + $0x8] sm:$0xff] (!%p239_p2)   ;;  %v895_v4 = vld [vmem:[%s1059_s3 + $0x10] sm:$0xff] (!%p239_p2)   ;;  %vm318_vm0 = vcmask (!%p239_p2), 261120   ;;  %vm692_vm1 = vcmask (!%p239_p2), 31744  }
   0x6   : > { %242 = sbr.rel (%p239_p2) target bundleno = 690 (0x2b2), region = 48  ;;  %p271_p3 = scmp.lt.s32.totalorder (!%p239_p2), %s762_s28, 31  ;;  %823 = vmatprep.subr.bf16.mxu0 (!%p239_p2), %v891_v0  ;;  %v893_v2 = vld [vmem:[%s1059_s3] sm:$0xff] (!%p239_p2)   ;;  %v894_v3 = vld [vmem:[%s1059_s3 + $0x8] sm:$0xff] (!%p239_p2)   ;;  %v896_v14 = vld [vmem:[%s1059_s3 + $0x18] sm:$0xff] (!%p239_p2)  }
   0x7   : > { %824 = vmatpush3.bf16.msra.mxu0 (!%p239_p2), %v891_v0  ;;  %835 = vmatprep.subr.bf16.mxu1 (!%p239_p2), %v893_v2  ;;  %v897_v17 = vld [vmem:[%s1059_s3 + $0x20] sm:$0xff] (!%p239_p2)   ;;  %v898_v19 = vld [vmem:[%s1059_s3 + $0x28] sm:$0xff] (!%p239_p2)   ;;  %v899_v20 = vld [vmem:[%s1059_s3 + $0x30] sm:$0xff] (!%p239_p2)  }
   0x8   : > { %825 = vmatprep.subr.bf16.mxu0 (!%p239_p2), %v892_v1  ;;  %836 = vmatpush3.bf16.msra.mxu1 (!%p239_p2), %v893_v2  ;;  %v900_v21 = vld [vmem:[%s1059_s3 + $0x38] sm:$0xff] (!%p239_p2)   ;;  %v901_v22 = vld [vmem:[%s1061_s5] sm:$0xff] (!%p239_p2)   ;;  %v902_v23 = vld [vmem:[%s1061_s5 + $0x8] sm:$0xff] (!%p239_p2)  }
   0x9   : > { %837 = vmatprep.subr.bf16.mxu1 (!%p239_p2), %v894_v3  ;;  %v903_v24 = vld [vmem:[%s1061_s5 + $0x10] sm:$0xff] (!%p239_p2)   ;;  %v904_v25 = vld [vmem:[%s1061_s5 + $0x18] sm:$0xff] (!%p239_p2)   ;;  %v905_v26 = vld [vmem:[%s1061_s5 + $0x20] sm:$0xff] (!%p239_p2)  }
   0xa   : > { %v906_v27 = vld [vmem:[%s1061_s5 + $0x28] sm:$0xff] (!%p239_p2)   ;;  %v766_v28 = vld [vmem:[%s1058_s2] ss:$0 sm:$0xff] (!%p239_p2)  ;;  %v907_v57 = vld [vmem:[%s1061_s5 + $0x30] sm:$0xff] (!%p239_p2)  }
   0xb   : > { %826 = vmatpush3.bf16.msra.mxu0 (!%p239_p2), %v892_v1  ;;  %v908_v58 = vld [vmem:[%s1061_s5 + $0x38] sm:$0xff] (!%p239_p2)   ;;  %v773_v59 = vld [vmem:[%s1060_s4] ss:$0 sm:$0xff] (!%p239_p2) }
   0xc   : > { %838 = vmatpush3.bf16.msra.mxu1 (!%p239_p2), %v894_v3  ;;  %859 = vmatprep.subr.bf16.mxu0 (!%p239_p2), %v901_v22 }
   0xd   : > { %s1065_s28 = smov (!%p271_p3, %s762_s28), 31  ;;  %839 = vmatprep.subr.bf16.mxu1 %v895_v4 }
   0xe   : > { %s763_s12 = sshll.u32 %s1065_s28, 3 }
   0xf   : > { %s274_s15 = scalar_lea.vmem %s1056_s0, %s763_s12  ;;  %s280_s11 = scalar_lea.vmem %s1063_s7, %s763_s12 }
  0x10   : > { %v283_v5 = vld [vmem:[%s274_s15] sm:$0xff]  ;;  %v284_v6 = vld [vmem:[%s274_s15 + $0x8] sm:$0xff]  ;;  %v285_v7 = vld [vmem:[%s274_s15 + $0x10] sm:$0xff]  ;;  %840 = vmatpush3.bf16.msra.mxu1 %v895_v4 }
  0x11   : > { %v291_v8 = vpack.c.bf16 %v284_v6, %v283_v5  ;;  %v286_v9 = vld [vmem:[%s274_s15 + $0x18] sm:$0xff]  ;;  %v287_v10 = vld [vmem:[%s274_s15 + $0x20] sm:$0xff]  ;;  %v288_v11 = vld [vmem:[%s274_s15 + $0x28] sm:$0xff]  ;;  %841 = vmatprep.subr.bf16.mxu1 %v896_v14 }
  0x12   : > { %v292_v12 = vpack.c.bf16 %v286_v9, %v285_v7  ;;  %v293_v13 = vpack.c.bf16 %v288_v11, %v287_v10  ;;  %v289_v15 = vld [vmem:[%s274_s15 + $0x30] sm:$0xff]  ;;  %v290_v16 = vld [vmem:[%s274_s15 + $0x38] sm:$0xff] }
  0x13   : > { %827 = vmatprep.mubr.msk.bf16.mxu0 %vm318_vm0, %v291_v8  ;;  %v294_v18 = vpack.c.bf16 %v290_v16, %v289_v15 }
  0x14   : > { %828 = vmatmul.mubr.msk.bf16.vlgmr.msra.gmra.mrb[0].mxu0 %vm318_vm0, %v292_v12  ;;  %842 = vmatpush3.bf16.msra.mxu1 %v896_v14 }
  0x15   : > { %831 = vmatprep.mubr.msk.bf16.mxu0 %vm318_vm0, %v293_v13  ;;  %843 = vmatprep.subr.bf16.mxu1 %v897_v17 }
  0x16   : > { %860 = vmatpush3.bf16.msra.mxu0 %v901_v22 }
  0x17   : > { %861 = vmatprep.subr.bf16.mxu0 %v902_v23 }
  0x18   : > { %844 = vmatpush3.bf16.msra.mxu1 %v897_v17 }
  0x19   : > { %845 = vmatprep.subr.bf16.mxu1 %v898_v19 }
  0x1a   : > { %862 = vmatpush3.bf16.msra.mxu0 %v902_v23 }
  0x1b   : > { %863 = vmatprep.subr.bf16.mxu0 %v903_v24 }
  0x1c   : > { %832 = vmatmul.mubr.msk.bf16.gmra.mrb[4].mxu0 %vm318_vm0, %v294_v18  ;;  %846 = vmatpush3.bf16.msra.mxu1 %v898_v19 }
  0x1d   : > { %847 = vmatprep.subr.bf16.mxu1 %v899_v20 }
  0x1e   : > { %864 = vmatpush3.bf16.msra.mxu0 %v903_v24  ;;  %v782_v24 = vld [vmem:[%s1062_s6] ss:$0 sm:$0xff] }
  0x1f   : > { %865 = vmatprep.subr.bf16.mxu0 %v904_v25 }
  0x20   : > { %848 = vmatpush3.bf16.msra.mxu1 %v899_v20 }
  0x21   : > { %849 = vmatprep.subr.bf16.mxu1 %v900_v21 }
  0x22   : > { %866 = vmatpush3.bf16.msra.mxu0 %v904_v25 }
  0x23   : > { %867 = vmatprep.subr.bf16.mxu0 %v905_v26 }
  0x24   : > { %850 = vmatpush3.bf16.msra.mxu1 %v900_v21 }
  0x26   : > { %868 = vmatpush3.bf16.msra.mxu0 %v905_v26 }
  0x27   : > { %869 = vmatprep.subr.bf16.mxu0 %v906_v27 }
  0x2a   : > { %870 = vmatpush3.bf16.msra.mxu0 %v906_v27 }
  0x2b   : > { %871 = vmatprep.subr.bf16.mxu0 %v907_v57 }
  0x2e   : > { %872 = vmatpush3.bf16.msra.mxu0 %v907_v57 }
  0x2f   : > { %873 = vmatprep.subr.bf16.mxu0 %v908_v58 }
  0x32   : > { %874 = vmatpush3.bf16.msra.mxu0 %v908_v58 }
  0xe7   : > { %v829_v29 = vpop.f32.mrb[0].mxu0 }
  0xe8   : > { %v374_v30 = vadd.f32 %v829_v29, %v766_v28  ;;  %v365_v31 = vpop.f32.mrb[1].mxu0 }
  0xe9   : > { %v366_v32 = vadd.f32 %v766_v28, %v365_v31  ;;  %v830_v33 = vpop.f32.mrb[2].mxu0 }
  0xea   : > { %v377_v34 = vadd.f32 %v830_v33, %v766_v28  ;;  %v368_v35 = vpop.f32.mrb[3].mxu0  ;;  %v398_v37 = vmax.f32 %v374_v30, 0.0 }
  0xeb   : > { %v369_v36 = vadd.f32 %v766_v28, %v368_v35  ;;  %v396_v39 = vmax.f32 %v366_v32, 0.0 }
  0xec   : > { %v399_v38 = vmax.f32 %v377_v34, 0.0 }
  0xed   : > { %v397_v40 = vmax.f32 %v369_v36, 0.0 }
  0xee   : > { %v405_v41 = vpack.c.bf16 %v399_v38, %v398_v37 }
  0xef   : > { %v833_v42 = vpop.f32.mrb[4].mxu0  ;;  %v404_v43 = vpack.c.bf16 %v397_v40, %v396_v39 }
  0xf0   : > { %v390_v44 = vadd.f32 %v833_v42, %v766_v28  ;;  %v381_v45 = vpop.f32.mrb[5].mxu0 }
  0xf1   : > { %v382_v46 = vadd.f32 %v766_v28, %v381_v45  ;;  %v834_v47 = vpop.f32.mrb[6].mxu0  ;;  %851 = vmatprep.mubr.bf16.mxu1 %v404_v43 }
  0xf2   : > { %v393_v48 = vadd.f32 %v834_v47, %v766_v28  ;;  %v384_v49 = vpop.f32.mrb[7].mxu0  ;;  %852 = vmatmul.mubr.bf16.vlgmr.msra.gmra.mrb[0].mxu1 %v405_v41  ;;  %v402_v51 = vmax.f32 %v390_v44, 0.0 }
  0xf3   : > { %v385_v50 = vadd.f32 %v766_v28, %v384_v49  ;;  %v400_v53 = vmax.f32 %v382_v46, 0.0 }
  0xf4   : > { %v403_v52 = vmax.f32 %v393_v48, 0.0 }
  0xf5   : > { %v401_v54 = vmax.f32 %v385_v50, 0.0 }
  0xf6   : > { %v407_v55 = vpack.c.bf16 %v403_v52, %v402_v51 }
  0xf7   : > { %v406_v56 = vpack.c.bf16 %v401_v54, %v400_v53 }
  0xf9   : > { %855 = vmatprep.mubr.bf16.mxu1 %v406_v56 }
  0xfa   : > { %856 = vmatmul.mubr.bf16.gmra.mrb[4].mxu1 %v407_v55 }
 0x1c5   : > { %v853_v60 = vpop.f32.mrb[0].mxu1 }
 0x1c6   : > { %v522_v61 = vadd.f32 %v853_v60, %v773_v59  ;;  %v513_v62 = vpop.f32.mrb[1].mxu1 }
 0x1c7   : > { %v514_v63 = vadd.f32 %v773_v59, %v513_v62  ;;  %v854_v0 = vpop.f32.mrb[2].mxu1 }
 0x1c8   : > { %v525_v1 = vadd.f32 %v854_v0, %v773_v59  ;;  %v516_v2 = vpop.f32.mrb[3].mxu1  ;;  %v546_v4 = vmax.f32 %v522_v61, 0.0 }
 0x1c9   : > { %v517_v3 = vadd.f32 %v773_v59, %v516_v2  ;;  %v544_v6 = vmax.f32 %v514_v63, 0.0 }
 0x1ca   : > { %v547_v5 = vmax.f32 %v525_v1, 0.0 }
 0x1cb   : > { %v545_v7 = vmax.f32 %v517_v3, 0.0 }
 0x1cc   : > { %v553_v8 = vpack.c.bf16 %v547_v5, %v546_v4 }
 0x1cd   : > { %v552_v9 = vpack.c.bf16 %v545_v7, %v544_v6  ;;  %v857_v10 = vpop.f32.mrb[4].mxu1 }
 0x1ce   : > { %v538_v11 = vadd.f32 %v857_v10, %v773_v59  ;;  %v529_v12 = vpop.f32.mrb[5].mxu1 }
 0x1cf   : > { %v530_v13 = vadd.f32 %v773_v59, %v529_v12  ;;  %v858_v14 = vpop.f32.mrb[6].mxu1  ;;  %875 = vmatprep.mubr.bf16.mxu0 %v552_v9 }
 0x1d0   : > { %v541_v15 = vadd.f32 %v858_v14, %v773_v59  ;;  %v532_v16 = vpop.f32.mrb[7].mxu1  ;;  %876 = vmatmul.mubr.bf16.vlgmr.msra.gmra.mrb[8].mxu0 %v553_v8  ;;  %v550_v18 = vmax.f32 %v538_v11, 0.0 }
 0x1d1   : > { %v533_v17 = vadd.f32 %v773_v59, %v532_v16  ;;  %v548_v20 = vmax.f32 %v530_v13, 0.0 }
 0x1d2   : > { %v551_v19 = vmax.f32 %v541_v15, 0.0 }
 0x1d3   : > { %v549_v21 = vmax.f32 %v533_v17, 0.0 }
 0x1d4   : > { %v555_v22 = vpack.c.bf16 %v551_v19, %v550_v18 }
 0x1d5   : > { %v554_v23 = vpack.c.bf16 %v549_v21, %v548_v20 }
 0x1d7   : > { %879 = vmatprep.mubr.bf16.mxu0 %v554_v23 }
 0x1d8   : > { %880 = vmatmul.mubr.bf16.gmra.mrb[12].mxu0 %v555_v22 }
 0x2a3   : > { %v877_v25 = vpop.f32.mrb[8].mxu0 }
 0x2a4   : > { %v670_v26 = vadd.f32 %v877_v25, %v782_v24  ;;  %v661_v27 = vpop.f32.mrb[9].mxu0 }
 0x2a5   : > { %v662_v28 = vadd.f32 %v782_v24, %v661_v27  ;;  %v878_v29 = vpop.f32.mrb[10].mxu0 }
 0x2a6   : > { %695 = vst.msk [vmem:[%s280_s11 + $0x10] sm:$0xff] %vm692_vm1, %v670_v26  ;;  %v673_v30 = vadd.f32 %v878_v29, %v782_v24  ;;  %v664_v31 = vpop.f32.mrb[11].mxu0 }
 0x2a7   : > { %693 = vst.msk [vmem:[%s280_s11] sm:$0xff] %vm692_vm1, %v662_v28  ;;  %v665_v32 = vadd.f32 %v782_v24, %v664_v31 }
 0x2a8   : > { %696 = vst.msk [vmem:[%s280_s11 + $0x18] sm:$0xff] %vm692_vm1, %v673_v30 }
 0x2a9   : > { %694 = vst.msk [vmem:[%s280_s11 + $0x8] sm:$0xff] %vm692_vm1, %v665_v32 }
 0x2ab   : > { %v881_v33 = vpop.f32.mrb[12].mxu0 }
 0x2ac   : > { %v686_v34 = vadd.f32 %v881_v33, %v782_v24  ;;  %v677_v35 = vpop.f32.mrb[13].mxu0 }
 0x2ad   : > { %v678_v36 = vadd.f32 %v782_v24, %v677_v35  ;;  %v882_v37 = vpop.f32.mrb[14].mxu0 }
 0x2ae   : > { %699 = vst.msk [vmem:[%s280_s11 + $0x30] sm:$0xff] %vm692_vm1, %v686_v34  ;;  %v689_v38 = vadd.f32 %v882_v37, %v782_v24  ;;  %v680_v39 = vpop.f32.mrb[15].mxu0 }
 0x2af   : > { %697 = vst.msk [vmem:[%s280_s11 + $0x20] sm:$0xff] %vm692_vm1, %v678_v36  ;;  %v681_v40 = vadd.f32 %v782_v24, %v680_v39 }
 0x2b0   : > { %700 = vst.msk [vmem:[%s280_s11 + $0x38] sm:$0xff] %vm692_vm1, %v689_v38 }
 0x2b1   : > { %698 = vst.msk [vmem:[%s280_s11 + $0x28] sm:$0xff] %vm692_vm1, %v681_v40 }
 0x2b2 PF: > { %s17_s24 = sadd.s32 1, %s915_s24  }
 0x2b3   : > { %p14_p4 = scmp.ge.s32.totalorder %s17_s24, 6  }
 0x2b5   :  { %16 = sbr.rel (!%p14_p4) target bundleno = 1 (0x1), region = 78 }

</bundles_post_ra>
